<compile_context>
chip_gen: v6e
topology: v6e:2x2x1
jax: 0.10.0
libtpu: 0.0.40
codegen_flags: <defaults>
</compile_context>

<pallas_src>
import jax
import jax.numpy as jnp
from jax.experimental import pallas as pl
from jax.experimental.pallas import tpu as pltpu


def _clm_head_kernel(x_ref, w_ref, o_ref):
    # x_ref: (tm, K) activation tile, w_ref: (K, tn) weight tile, o_ref: (tm, tn) logits.
    # Single MXU call; accumulation stays in f32 regardless of operand dtype.
    o_ref[...] = jnp.dot(
        x_ref[...], w_ref[...], preferred_element_type=jnp.float32
    ).astype(o_ref.dtype)


def prepare_clm_head_weight(decoder_weight: jax.Array, compute_dtype=jnp.bfloat16) -> jax.Array:
    """One-time (init) prep of the PyTorch nn.Linear weight.

    decoder_weight: (vocab_size, dim_model) as stored by nn.Linear.
    Returns the (dim_model, vocab_size) operand, optionally cast to the compute dtype.
    Call this ONCE at parameter init -- never per forward call (hot-path cast fix).
    """
    w_t = decoder_weight.T
    if compute_dtype is not None:
        w_t = w_t.astype(compute_dtype)
    return w_t


def _vmem_budget_bytes() -> int:
    try:
        phys = int(pltpu.get_tpu_info().vmem_capacity_bytes)
    except Exception:
        phys = 64 << 20  # conservative fallback: v7x per-TC capacity
    # Leave headroom for Mosaic internal scratch / semaphores / compiler slack.
    return (phys * 3) // 4


def _auto_tiles(M, K, N, x_isz, w_isz, o_isz, tm_req, tn_req, budget):
    sub = max(8, 32 // x_isz)  # sublane packing multiple for the token axis

    # ---- vocab tile ----
    if tn_req is None:
        tn_req = 2048  # v5e/v6e sweet spot; shrunk below if the VMEM budget disallows it
    if N <= tn_req:
        tn = N  # single vocab tile ("equal full dim" case; any width allowed)
    else:
        tn = max(128, (tn_req // 128) * 128)

    # ---- token tile ----
    if tm_req is None:
        # Decode / small prefill: keep the whole activation slab resident; its block index
        # is then constant across the grid so it is DMA'd once -> pure weight stream.
        tm_req = M if (M * K * x_isz <= (8 << 20) or M <= 512) else 512
    if M <= tm_req:
        tm = M
    else:
        tm = max(sub, (tm_req // sub) * sub)

    def need(tm_, tn_):
        # Double-buffered activation / weight / output tiles.
        return 2 * (tm_ * K * x_isz + K * tn_ * w_isz + tm_ * tn_ * o_isz)

    # Shrink (vocab first, then tokens) until the working set fits the per-generation
    # VMEM budget (matters for the f32 path on v7x's 64 MiB per-TC VMEM).
    while need(tm, tn) > budget:
        if tn > 256:
            tn = max(128, (tn // 2) // 128 * 128)
        elif tm > 4 * sub:
            tm = max(sub, (tm // 2) // sub * sub)
        else:
            break
    return tm, tn


def clm_head(
    hidden_states: jax.Array,
    weight_t: jax.Array,
    *,
    tm: int | None = None,
    tn: int | None = None,
    out_dtype=None,
    vmem_limit_bytes: int | None = None,
) -> jax.Array:
    """hidden_states: (B, S, K), weight_t: (K, N) -> logits: (B, S, N).

    Compute dtype follows weight_t.dtype (store the LM-head weight in bf16 at init for the
    production path); activations are cast to match (the cheap operand).  f32 accumulation.
    """
    B, S, K = hidden_states.shape
    Kw, N = weight_t.shape
    assert K == Kw, "dim_model mismatch"

    out_dtype = out_dtype if out_dtype is not None else hidden_states.dtype
    # TODO(synk): for training-sized M the biggest remaining lever is fusing the downstream
    # softmax / cross-entropy so the (M, N) logits never materialize in HBM.

    M = B * S
    x2d = hidden_states.reshape(M, K)
    if x2d.dtype != weight_t.dtype:
        x2d = x2d.astype(weight_t.dtype)  # cast only the SMALL operand; never the weight

    x_isz = x2d.dtype.itemsize
    w_isz = weight_t.dtype.itemsize
    o_isz = jnp.dtype(out_dtype).itemsize

    budget = _vmem_budget_bytes()
    tm_eff, tn_eff = _auto_tiles(M, K, N, x_isz, w_isz, o_isz, tm, tn, budget)

    # cdiv grid, no padding, no output slice: Pallas masks boundary blocks.  Since K is not
    # tiled, out-of-bounds garbage only ever contributes to discarded rows/cols.
    grid = (pl.cdiv(N, tn_eff), pl.cdiv(M, tm_eff))  # M fastest -> each weight tile DMA'd once

    tile_bytes = 2 * (tm_eff * K * x_isz + K * tn_eff * w_isz + tm_eff * tn_eff * o_isz)
    if vmem_limit_bytes is None:
        vmem_limit_bytes = int(min(max(tile_bytes * 5 // 4, 16 << 20), budget))

    n_vocab_tiles = pl.cdiv(N, tn_eff)
    cost = pl.CostEstimate(
        flops=2 * M * K * N,
        transcendentals=0,
        # Activations re-stream once per vocab tile; weight and logits stream once.
        bytes_accessed=int(n_vocab_tiles * M * K * x_isz + K * N * w_isz + M * N * o_isz),
    )

    logits2d = pl.pallas_call(
        _clm_head_kernel,
        out_shape=jax.ShapeDtypeStruct((M, N), out_dtype),
        grid_spec=pltpu.PrefetchScalarGridSpec(
            num_scalar_prefetch=0,
            grid=grid,
            in_specs=[
                pl.BlockSpec((tm_eff, K), lambda j, i: (i, 0)),   # activations (small, re-streamed)
                pl.BlockSpec((K, tn_eff), lambda j, i: (0, j)),   # weights (once per vocab tile)
            ],
            out_specs=pl.BlockSpec((tm_eff, tn_eff), lambda j, i: (i, j)),
        ),
        compiler_params=pltpu.CompilerParams(
            # Vocab axis parallel / token axis arbitrary: a v7x megacore split lands on the
            # vocab axis so each TC reads disjoint (K, tn) weight columns.
            dimension_semantics=("parallel", "arbitrary"),
            vmem_limit_bytes=vmem_limit_bytes,
        ),
        cost_estimate=cost,
    )(x2d, weight_t)

    return logits2d.reshape(B, S, N)


if __name__ == "__main__":
    # Small config consistent with the module: dim_model=32, vocab_size=256.
    batch, seq_len, dim_model, vocab_size = 2, 8, 32, 256

    key = jax.random.PRNGKey(0)
    k_x, k_w = jax.random.split(key)

    hidden_states = jax.random.normal(k_x, (batch, seq_len, dim_model), dtype=jnp.float32)
    # PyTorch decoder weight is (vocab_size, dim_model); prepare (transpose + cast) ONCE.
    decoder_weight = jax.random.normal(k_w, (vocab_size, dim_model), dtype=jnp.float32) * 0.02

    ref = hidden_states @ decoder_weight.T

    # f32 path -- exact check against the plain JAX reference (== nn.Linear, bias=False).
    w_t_f32 = prepare_clm_head_weight(decoder_weight, compute_dtype=None)
    logits = jax.block_until_ready(clm_head(hidden_states, w_t_f32))
    assert logits.shape == (batch, seq_len, vocab_size)
    assert jnp.allclose(logits, ref, atol=1e-5, rtol=1e-5)

    # Production path: weight stored in bf16 (cast once above, never inside the call).
    w_t_bf16 = prepare_clm_head_weight(decoder_weight, compute_dtype=jnp.bfloat16)
    logits_bf16 = jax.block_until_ready(clm_head(hidden_states, w_t_bf16))
    assert logits_bf16.shape == (batch, seq_len, vocab_size)
    assert jnp.allclose(logits_bf16, ref, atol=5e-2, rtol=5e-2)

    # Non-divisible M / vocab with explicit small tiles: exercises the cdiv grid +
    # masked boundary blocks (no jnp.pad of the weight, no output slice).
    hs_odd = jax.random.normal(jax.random.PRNGKey(1), (1, 10, dim_model), dtype=jnp.float32)
    w_odd = jax.random.normal(jax.random.PRNGKey(2), (300, dim_model), dtype=jnp.float32) * 0.02
    logits_odd = jax.block_until_ready(
        clm_head(hs_odd, prepare_clm_head_weight(w_odd, compute_dtype=None), tm=8, tn=128)
    )
    assert logits_odd.shape == (1, 10, 300)
    assert jnp.allclose(logits_odd, hs_odd @ w_odd.T, atol=1e-5, rtol=1e-5)

    print("KERNEL_OK")
</pallas_src>

<mosaic_0001>
module attributes {stable_mosaic.version = 11 : i64} {
  func.func @_clm_head_kernel(%arg0: i32, %arg1: i32, %arg2: memref<16x32xf32, #tpu.memory_space<vmem>>, %arg3: memref<32x256xf32, #tpu.memory_space<vmem>>, %arg4: memref<16x256xf32, #tpu.memory_space<vmem>>) attributes {dimension_semantics = [#tpu.dimension_semantics<parallel>, #tpu.dimension_semantics<arbitrary>], iteration_bounds = array<i64: 1, 1>, scalar_prefetch = 0 : i64, scratch_operands = 0 : i64, tpu.core_type = #tpu.core_type<tc>, window_params = [{transform_indices = @transform_0, window_bounds = array<i64: 16, 32>}, {transform_indices = @transform_1, window_bounds = array<i64: 32, 256>}, {transform_indices = @transform_2, window_bounds = array<i64: 16, 256>}]} {
    %c0 = arith.constant 0 : index
    %c0_0 = arith.constant 0 : index
    %0 = vector.load %arg2[%c0, %c0_0] : memref<16x32xf32, #tpu.memory_space<vmem>>, vector<16x32xf32>
    %c0_1 = arith.constant 0 : index
    %c0_2 = arith.constant 0 : index
    %1 = vector.load %arg3[%c0_1, %c0_2] : memref<32x256xf32, #tpu.memory_space<vmem>>, vector<32x256xf32>
    %cst = arith.constant dense<0.000000e+00> : vector<16x256xf32>
    %2 = tpu.matmul %0, %1, %cst {dimension_numbers = #tpu.dot_dimension_numbers<[1], [0], [0], [1], [0, 0, 1, 1], [], []>} : vector<16x32xf32>, vector<32x256xf32>, vector<16x256xf32> -> vector<16x256xf32>
    %c0_3 = arith.constant 0 : index
    %c0_4 = arith.constant 0 : index
    %3 = vector.load %arg4[%c0_3, %c0_4] : memref<16x256xf32, #tpu.memory_space<vmem>>, vector<16x256xf32>
    tpu.vector_store %arg4[%c0_3, %c0_4], %2 {strides = array<i32>} : memref<16x256xf32, #tpu.memory_space<vmem>>, vector<16x256xf32>,
    return
  }
  func.func @transform_0(%arg0: i32, %arg1: i32) -> (i32, i32) {
    %c0_i32 = arith.constant 0 : i32
    %c0_i32_0 = arith.constant 0 : i32
    return %arg1, %c0_i32 : i32, i32
  }
  func.func @transform_1(%arg0: i32, %arg1: i32) -> (i32, i32) {
    %c0_i32 = arith.constant 0 : i32
    %c0_i32_0 = arith.constant 0 : i32
    return %c0_i32, %arg0 : i32, i32
  }
  func.func @transform_2(%arg0: i32, %arg1: i32) -> (i32, i32) {
    %c0_i32 = arith.constant 0 : i32
    return %arg1, %arg0 : i32, i32
  }
}

</mosaic_0001>

<bundles_post_ra>
// kernel: tpu_custom_call.1
= control target key start
LH: loop header
LB: loop body
LE: loop exit
PB: predicated region body
PF: predicated region fallthrough
CT: control target
= control target key end

     0   :  { %7 = vsyncpa [#allocation3], 0  ;;  %s278_s0 = inlined_call_operand.hbm [shape: f32[16,32], index: 0, kind: input, shape index: {}]   ;;  %s279_s1 = inlined_call_operand.hbm [shape: f32[32,256], index: 1, kind: input, shape index: {}]   ;;  %s280_s2 = inlined_call_operand.hbm [shape: f32[16,256], index: 2, kind: output, shape index: {}]  }
   0x1   :  { %8 = vsyncpa [#allocation6], 0 }
   0x2   :  { %9 = vsyncpa [#allocation4], 0  ;;  %s240_s9 = smov [#allocation2]  }
   0x3   :  { %s15_s10 = sshll.u32 %s240_s9, 4  ;;  %s16_s10 = int_to_ptr.vmem [resolvable:$true] %s15_s10 }
   0x4   :  { %s182_s11 = scalar_lea.vmem %s16_s10, 256  ;;  %p187_p1 = scmp.lt.s32.totalorder %s16_s10, %s16_s10 }
   0x5   :  { %p183_p0 = scmp.ne.s32.totalorder %s16_s10, %s182_s11  ;;  %p188_p2 = scmp.lt.s32.totalorder %s182_s11, %s182_s11 }
   0x7   :  { %p189_p3 = por %p188_p2, %p187_p1 }
   0x9   :  { %p190_p4 = pnand %p189_p3, %p183_p0 }
   0xb   :  { %193 = shalt.err (!%p190_p4)
}
   0xc   :  { %s241_s12 = smov 128   ;;  %s242_s13 = smov 8  }
   0xd   :  { %21 = dma.hbm_to_vmem [thread:$0]  %s278_s0, 256, %s16_s10, [#allocation3], %s241_s12, %s241_s12, %s242_s13  }
   0xe   :  { %s243_s16 = smov [#allocation5]  }
   0xf   :  { %s27_s17 = sshll.u32 %s243_s16, 4  ;;  %s28_s17 = int_to_ptr.vmem [resolvable:$true] %s27_s17 }
  0x10   :  { %s202_s18 = scalar_lea.vmem %s28_s17, 1024  ;;  %p207_p6 = scmp.lt.s32.totalorder %s28_s17, %s28_s17 }
  0x11   :  { %p203_p5 = scmp.ne.s32.totalorder %s28_s17, %s202_s18  ;;  %p208_p7 = scmp.lt.s32.totalorder %s202_s18, %s202_s18 }
  0x13   :  { %p209_p8 = por %p208_p7, %p207_p6 }
  0x15   :  { %p210_p9 = pnand %p209_p8, %p203_p5 }
  0x17   :  { %213 = shalt.err (!%p210_p9)
}
  0x18   :  { %s244_s19 = smov 256   ;;  %s245_s20 = smov 16  }
  0x19   :  { %33 = dma.hbm_to_vmem [thread:$0]  %s279_s1, 1024, %s28_s17, [#allocation6], %s244_s19, %s244_s19, %s245_s20  }
  0x1a   :  { %234 = dma.done.wait [#allocation3], 256  }
  0x1b   :  { %235 = vsyncadd [#allocation3], 4294967040 }
  0x1c   :  { %236 = dma.done.wait [#allocation6], 1024  }
  0x1d   :  { %237 = vsyncadd [#allocation6], 4294966272  ;;  %v246_v0 = vmov 0.0   ;;  %v49_v1 = vld [vmem:[#allocation5 + $0x38] sm:$0xff]  ;;  %v48_v2 = vld [vmem:[#allocation5 + $0x30] sm:$0xff]  ;;  %vm50_vm0 = vcmask 261120  }
  0x1e   :  { %121 = vmatprep.mubr.f32.mxu0 %v246_v0  ;;  %127 = vmatprep.mubr.f32.mxu1 %v246_v0  ;;  %v47_v3 = vld [vmem:[#allocation5 + $0x28] sm:$0xff]  ;;  %v46_v4 = vld [vmem:[#allocation5 + $0x20] sm:$0xff]  ;;  %v45_v5 = vld [vmem:[#allocation5 + $0x18] sm:$0xff]  ;;  %s247_s0 = smov [#allocation7]  }
  0x1f   :  { %81 = vmatprep.subr.mxu0 %v49_v1  ;;  %158 = vmatprep.subr.mxu1 %v49_v1  ;;  %v44_v6 = vld [vmem:[#allocation5 + $0x10] sm:$0xff]  ;;  %v43_v7 = vld [vmem:[#allocation5 + $0x8] sm:$0xff]  ;;  %v42_v8 = vld [vmem:[#allocation5] sm:$0xff]  ;;  %s143_s1 = sshll.u32 %s247_s0, 4  ;;  %s144_s1 = int_to_ptr.vmem [resolvable:$true] %s143_s1 }
  0x20   :  { %82 = vmatpush1.msra.mxu0 %v48_v2  ;;  %162 = vmatpush1.msra.mxu1 %v48_v2  ;;  %v40_v9 = vld [vmem:[#allocation2] sm:$0xff]  ;;  %v41_v10 = vld [vmem:[#allocation2 + $0x8] sm:$0xff]  ;;  %s214_s23 = scalar_lea.vmem %s144_s1, 512  ;;  %p219_p11 = scmp.lt.s32.totalorder %s144_s1, %s144_s1 }
  0x21   :  { %83 = vmatprep.subr.mxu0 %v47_v3  ;;  %159 = vmatprep.subr.mxu1 %v47_v3  ;;  %p215_p10 = scmp.ne.s32.totalorder %s144_s1, %s214_s23  ;;  %p220_p12 = scmp.lt.s32.totalorder %s214_s23, %s214_s23 }
  0x22   :  { %84 = vmatpush1.msra.mxu0 %v46_v4  ;;  %163 = vmatpush1.msra.mxu1 %v46_v4 }
  0x23   :  { %85 = vmatprep.subr.mxu0 %v45_v5  ;;  %160 = vmatprep.subr.mxu1 %v45_v5  ;;  %p221_p13 = por %p220_p12, %p219_p11 }
  0x24   :  { %86 = vmatpush1.msra.mxu0 %v44_v6  ;;  %164 = vmatpush1.msra.mxu1 %v44_v6 }
  0x25   :  { %87 = vmatprep.subr.mxu0 %v43_v7  ;;  %161 = vmatprep.subr.mxu1 %v43_v7  ;;  %p222_p0 = pnand %p221_p13, %p215_p10 }
  0x26   :  { %88 = vmatpush1.msra.mxu0 %v42_v8  ;;  %165 = vmatpush1.msra.mxu1 %v42_v8 }
  0x27   :  { %156 = vmatmul.mubr.msk.f32.vlgmr.msra.gmra.mxu0 %vm50_vm0, %v40_v9  ;;  %157 = vmatmul.mubr.msk.f32.vlgmr.msra.gmra.mxu1 %vm50_vm0, %v41_v10 }
  0xe7   :  { %v123_v11 = vpop.f32.mrf.mxu0  ;;  %v129_v12 = vpop.f32.mrf.mxu1 }
  0xe8   :  { %134 = vst [vmem:[#allocation7] sm:$0xff] %v123_v11  ;;  %136 = vst [vmem:[#allocation7 + $0x10] sm:$0xff] %v129_v12 }
  0xe9   :  { %v125_v13 = vpop.f32.mrf.mxu0  ;;  %v131_v14 = vpop.f32.mrf.mxu1 }
  0xea   :  { %135 = vst [vmem:[#allocation7 + $0x8] sm:$0xff] %v125_v13  ;;  %137 = vst [vmem:[#allocation7 + $0x18] sm:$0xff] %v131_v14 }
  0xeb   :  { %225 = shalt.err (!%p222_p0)
}
  0xec   :  { %149 = dma.vmem_to_hbm [thread:$0]  %s144_s1, 512, %s280_s2, [#allocation4], %s244_s19, %s244_s19, %s245_s20  }
  0xed   :  { %238 = dma.done.wait [#allocation4], 512  }
  0xee   :  { %239 = vsyncadd [#allocation4], 4294966784 }
  0xef   :  { %153 = vsyncpa [#allocation3], 1 }
  0xf0   :  { %154 = vsyncpa [#allocation6], 1 }
  0xf1   :  { %155 = vsyncpa [#allocation4], 1 }

</bundles_post_ra>
